<compile_context>
chip_gen: v7x
topology: tpu7x:2x2x1
jax: 0.10.0
libtpu: 0.0.40
codegen_flags: <defaults>
</compile_context>

<pallas_src>
import functools

import jax
import jax.numpy as jnp
from jax import lax
from jax.experimental import pallas as pl
from jax.experimental.pallas import tpu as pltpu  # noqa: F401  (not needed: no grid / default VMEM placement)

# ----------------------------- problem sizes --------------------------------
T = 2      # tasks (meta-batch)
K = 16     # support-set size per task
Q = 16     # query-set size per task
IN = 8     # input dim
H = 32     # hidden dim
OUT = 8    # output dim
INIT_LR = 0.05  # deterministic stand-in for random.uniform(0.005, 0.1)

assert K == Q and IN == OUT, "data packing assumes K == Q and IN == OUT"

# --------------------- packed-buffer layout (8-row aligned) ------------------
def _aligned_offsets(row_counts, align=8):
    offs, off = [], 0
    for r in row_counts:
        offs.append(off)
        off += ((r + align - 1) // align) * align
    return tuple(offs), off

# wide buffer (last dim = H): w1t, b1, w2t, b2, lw1t, lb1, lw2t, lb2
(_O_W1, _O_B1, _O_W2, _O_B2,
 _O_LW1, _O_LB1, _O_LW2, _O_LB2), _WIDE_TOTAL = _aligned_offsets(
    (IN, 1, H, 1, IN, 1, H, 1))
# narrow buffer (last dim = OUT): w3t, b3, lw3t, lb3
(_O_W3, _O_B3, _O_LW3, _O_LB3), _NARROW_TOTAL = _aligned_offsets((H, 1, H, 1))

# dot_general dimension numbers (all MXU-friendly, no explicit transposes)
_NN = (((1,), (0,)), ((), ()))   # A @ B
_NT = (((1,), (1,)), ((), ()))   # A @ B.T
_TN = (((0,), (0,)), ((), ()))   # A.T @ B


# ------------------------------ Pallas kernel --------------------------------
def metasgd_kernel(data_ref, pw_ref, pn_ref, loss_ref):
    f32 = jnp.float32
    dot = functools.partial(lax.dot_general, preferred_element_type=f32)
    NK = T * K

    # ---- task data (all tasks, batched) ----
    kx = data_ref[0 * NK:1 * NK, :]          # (T*K, IN)
    ky = data_ref[1 * NK:2 * NK, :]          # (T*K, OUT)
    qx = data_ref[2 * NK:3 * NK, :]          # (T*Q, IN)
    qy = data_ref[3 * NK:4 * NK, :]          # (T*Q, OUT)

    # ---- slow weights / per-parameter lrs (pre-transposed: x @ W layout) ----
    w1 = pw_ref[_O_W1:_O_W1 + IN, :]
    b1 = pw_ref[_O_B1:_O_B1 + 1, :]
    w2 = pw_ref[_O_W2:_O_W2 + H, :]
    b2 = pw_ref[_O_B2:_O_B2 + 1, :]
    lw1 = pw_ref[_O_LW1:_O_LW1 + IN, :]
    lb1 = pw_ref[_O_LB1:_O_LB1 + 1, :]
    lw2 = pw_ref[_O_LW2:_O_LW2 + H, :]
    lb2 = pw_ref[_O_LB2:_O_LB2 + 1, :]
    w3 = pn_ref[_O_W3:_O_W3 + H, :]
    b3 = pn_ref[_O_B3:_O_B3 + 1, :]
    lw3 = pn_ref[_O_LW3:_O_LW3 + H, :]
    lb3 = pn_ref[_O_LB3:_O_LB3 + 1, :]

    # ---- support forward: slow weights are shared, so batch all T*K rows ----
    z1 = dot(kx, w1, _NN) + b1               # (T*K, H)
    h1 = jnp.maximum(z1, 0.0)
    z2 = dot(h1, w2, _NN) + b2               # (T*K, H)
    h2 = jnp.maximum(z2, 0.0)
    pk = dot(h2, w3, _NN) + b3               # (T*K, OUT)

    # ---- MSE backward (per-task scale 2/(K*OUT) is identical per task) ----
    d3 = (2.0 / (K * OUT)) * (pk - ky)                   # (T*K, OUT)
    d2 = jnp.where(z2 > 0.0, dot(d3, w3, _NT), 0.0)      # (T*K, H)
    d1 = jnp.where(z1 > 0.0, dot(d2, w2, _NT), 0.0)      # (T*K, H)

    total = jnp.zeros((1, 1), f32)
    for t in range(T):                        # unrolled: T is a tiny static constant
        sl = slice(t * K, (t + 1) * K)
        # per-task gradients: contract the support axis (act.T @ d, no transposes)
        g_w3 = dot(h2[sl], d3[sl], _TN)                   # (H, OUT)
        g_b3 = jnp.sum(d3[sl], axis=0, keepdims=True)     # (1, OUT)
        g_w2 = dot(h1[sl], d2[sl], _TN)                   # (H, H)
        g_b2 = jnp.sum(d2[sl], axis=0, keepdims=True)     # (1, H)
        g_w1 = dot(kx[sl], d1[sl], _TN)                   # (IN, H)
        g_b1 = jnp.sum(d1[sl], axis=0, keepdims=True)     # (1, H)

        # Meta-SGD inner step (elementwise per-parameter lr), transposed layout
        fw1 = w1 - lw1 * g_w1; fb1 = b1 - lb1 * g_b1
        fw2 = w2 - lw2 * g_w2; fb2 = b2 - lb2 * g_b2
        fw3 = w3 - lw3 * g_w3; fb3 = b3 - lb3 * g_b3

        # query forward with this task's fast weights
        a1 = jnp.maximum(dot(qx[sl], fw1, _NN) + fb1, 0.0)   # (Q, H)
        a2 = jnp.maximum(dot(a1, fw2, _NN) + fb2, 0.0)       # (Q, H)
        pq = dot(a2, fw3, _NN) + fb3                         # (Q, OUT)
        diff = pq - qy[sl]
        total = total + jnp.sum(diff * diff, keepdims=True)  # (1, 1)

    # losses / T, with each task's mean 1/(Q*OUT) folded into one final scale.
    loss_ref[...] = total * (1.0 / (T * Q * OUT))


# ------------------------------ wrapper ---------------------------------------
def _pack_rows(pieces, offsets, total_rows):
    cols = pieces[0].shape[1]
    buf = jnp.zeros((total_rows, cols), jnp.float32)
    for piece, off in zip(pieces, offsets):
        buf = buf.at[off:off + piece.shape[0], :].set(piece)
    return buf


def metasgd_forward(k_x, k_y, q_x, q_y, params, lrs):
    """Returns scalar: sum_i mse(net(q_x[i], fast_w_i), q_y[i]) / T."""
    w1, b1, w2, b2, w3, b3 = params
    lw1, lb1, lw2, lb2, lw3, lb3 = lrs

    # Pre-transpose weights + their lrs so the kernel computes x @ W everywhere,
    # and pack everything into 3 refs with 8-aligned static row offsets.
    pw = _pack_rows(
        (w1.T, b1, w2.T, b2, lw1.T, lb1, lw2.T, lb2),
        (_O_W1, _O_B1, _O_W2, _O_B2, _O_LW1, _O_LB1, _O_LW2, _O_LB2),
        _WIDE_TOTAL)
    pn = _pack_rows(
        (w3.T, b3, lw3.T, lb3),
        (_O_W3, _O_B3, _O_LW3, _O_LB3),
        _NARROW_TOTAL)
    data = jnp.concatenate(
        [k_x.reshape(T * K, IN), k_y.reshape(T * K, OUT),
         q_x.reshape(T * Q, IN), q_y.reshape(T * Q, OUT)], axis=0)  # (4*T*K, IN)

    # No grid: single invocation, whole (tiny) arrays resident in VMEM,
    # scalar loss written exactly once.
    out = pl.pallas_call(
        metasgd_kernel,
        out_shape=jax.ShapeDtypeStruct((1, 1), jnp.float32),
    )(data, pw, pn)
    return out[0, 0]


# ------------------------------ pure-JAX reference ---------------------------
def _net(x, p):
    w1, b1, w2, b2, w3, b3 = p
    h = jnp.maximum(x @ w1.T + b1, 0.0)
    h = jnp.maximum(h @ w2.T + b2, 0.0)
    return h @ w3.T + b3


def reference_forward(k_x, k_y, q_x, q_y, params, lrs):
    def per_task(kx, ky, qx, qy):
        loss_k = lambda p: jnp.mean((_net(kx, p) - ky) ** 2)
        grads = jax.grad(loss_k)(params)
        fast = tuple(p - lr * g for p, lr, g in zip(params, lrs, grads))
        return jnp.mean((_net(qx, fast) - qy) ** 2)

    losses = sum(per_task(k_x[i], k_y[i], q_x[i], q_y[i]) for i in range(T))
    return losses / T


# ------------------------------------ main ------------------------------------
if __name__ == "__main__":
    key = jax.random.PRNGKey(0)
    ks = jax.random.split(key, 10)

    # Deterministic synthetic weights (Net.__init__ stand-in).
    w1 = 0.1 * jax.random.normal(ks[0], (H, IN), jnp.float32)
    b1 = jnp.zeros((1, H), jnp.float32)
    w2 = 0.1 * jax.random.normal(ks[1], (H, H), jnp.float32)
    b2 = jnp.zeros((1, H), jnp.float32)
    w3 = 0.1 * jax.random.normal(ks[2], (OUT, H), jnp.float32)
    b3 = jnp.zeros((1, OUT), jnp.float32)
    params = (w1, b1, w2, b2, w3, b3)

    # Meta-SGD per-parameter learning rates: init_lr * ones_like(param).
    lrs = tuple(jnp.full(p.shape, INIT_LR, jnp.float32) for p in params)

    # Synthetic tasks.
    k_x = jax.random.normal(ks[3], (T, K, IN), jnp.float32)
    k_y = jax.random.normal(ks[4], (T, K, OUT), jnp.float32)
    q_x = jax.random.normal(ks[5], (T, Q, IN), jnp.float32)
    q_y = jax.random.normal(ks[6], (T, Q, OUT), jnp.float32)

    loss = jax.block_until_ready(
        jax.jit(metasgd_forward)(k_x, k_y, q_x, q_y, params, lrs))
    ref = jax.block_until_ready(
        reference_forward(k_x, k_y, q_x, q_y, params, lrs))

    assert jnp.allclose(loss, ref, rtol=1e-4, atol=1e-5), (loss, ref)
    print("KERNEL_OK")
</pallas_src>

<mosaic_0001>
module attributes {stable_mosaic.version = 11 : i64} {
  func.func @metasgd_kernel(%arg0: memref<128x8xf32, #tpu.memory_space<vmem>>, %arg1: memref<112x32xf32, #tpu.memory_space<vmem>>, %arg2: memref<80x8xf32, #tpu.memory_space<vmem>>, %arg3: memref<1x1xf32, #tpu.memory_space<vmem>>) attributes {dimension_semantics = [], scalar_prefetch = 0 : i64, scratch_operands = 0 : i64, tpu.core_type = #tpu.core_type<tc>} {
    %c0 = arith.constant 0 : index
    %c0_0 = arith.constant 0 : index
    %0 = vector.load %arg0[%c0, %c0_0] : memref<128x8xf32, #tpu.memory_space<vmem>>, vector<32x8xf32>
    %c32 = arith.constant 32 : index
    %c0_1 = arith.constant 0 : index
    %1 = vector.load %arg0[%c32, %c0_1] : memref<128x8xf32, #tpu.memory_space<vmem>>, vector<32x8xf32>
    %c64 = arith.constant 64 : index
    %c0_2 = arith.constant 0 : index
    %2 = vector.load %arg0[%c64, %c0_2] : memref<128x8xf32, #tpu.memory_space<vmem>>, vector<32x8xf32>
    %c96 = arith.constant 96 : index
    %c0_3 = arith.constant 0 : index
    %3 = vector.load %arg0[%c96, %c0_3] : memref<128x8xf32, #tpu.memory_space<vmem>>, vector<32x8xf32>
    %c0_4 = arith.constant 0 : index
    %c0_5 = arith.constant 0 : index
    %4 = vector.load %arg1[%c0_4, %c0_5] : memref<112x32xf32, #tpu.memory_space<vmem>>, vector<8x32xf32>
    %c8 = arith.constant 8 : index
    %c0_6 = arith.constant 0 : index
    %5 = vector.load %arg1[%c8, %c0_6] : memref<112x32xf32, #tpu.memory_space<vmem>>, vector<1x32xf32>
    %c16 = arith.constant 16 : index
    %c0_7 = arith.constant 0 : index
    %6 = vector.load %arg1[%c16, %c0_7] : memref<112x32xf32, #tpu.memory_space<vmem>>, vector<32x32xf32>
    %c48 = arith.constant 48 : index
    %c0_8 = arith.constant 0 : index
    %7 = vector.load %arg1[%c48, %c0_8] : memref<112x32xf32, #tpu.memory_space<vmem>>, vector<1x32xf32>
    %c56 = arith.constant 56 : index
    %c0_9 = arith.constant 0 : index
    %8 = vector.load %arg1[%c56, %c0_9] : memref<112x32xf32, #tpu.memory_space<vmem>>, vector<8x32xf32>
    %c64_10 = arith.constant 64 : index
    %c0_11 = arith.constant 0 : index
    %9 = vector.load %arg1[%c64_10, %c0_11] : memref<112x32xf32, #tpu.memory_space<vmem>>, vector<1x32xf32>
    %c72 = arith.constant 72 : index
    %c0_12 = arith.constant 0 : index
    %10 = vector.load %arg1[%c72, %c0_12] : memref<112x32xf32, #tpu.memory_space<vmem>>, vector<32x32xf32>
    %c104 = arith.constant 104 : index
    %c0_13 = arith.constant 0 : index
    %11 = vector.load %arg1[%c104, %c0_13] : memref<112x32xf32, #tpu.memory_space<vmem>>, vector<1x32xf32>
    %c0_14 = arith.constant 0 : index
    %c0_15 = arith.constant 0 : index
    %12 = vector.load %arg2[%c0_14, %c0_15] : memref<80x8xf32, #tpu.memory_space<vmem>>, vector<32x8xf32>
    %c32_16 = arith.constant 32 : index
    %c0_17 = arith.constant 0 : index
    %13 = vector.load %arg2[%c32_16, %c0_17] : memref<80x8xf32, #tpu.memory_space<vmem>>, vector<1x8xf32>
    %c40 = arith.constant 40 : index
    %c0_18 = arith.constant 0 : index
    %14 = vector.load %arg2[%c40, %c0_18] : memref<80x8xf32, #tpu.memory_space<vmem>>, vector<32x8xf32>
    %c72_19 = arith.constant 72 : index
    %c0_20 = arith.constant 0 : index
    %15 = vector.load %arg2[%c72_19, %c0_20] : memref<80x8xf32, #tpu.memory_space<vmem>>, vector<1x8xf32>
    %cst = arith.constant dense<0.000000e+00> : vector<32x32xf32>
    %16 = tpu.matmul %0, %4, %cst {dimension_numbers = #tpu.dot_dimension_numbers<[1], [0], [0], [1], [0, 0, 1, 1], [], []>} : vector<32x8xf32>, vector<8x32xf32>, vector<32x32xf32> -> vector<32x32xf32>
    %17 = vector.broadcast %5 : vector<1x32xf32> to vector<32x32xf32>
    %18 = arith.addf %16, %17 : vector<32x32xf32>
    %cst_21 = arith.constant 0.000000e+00 : f32
    %19 = vector.broadcast %cst_21 : f32 to vector<32x32xf32>
    %20 = arith.maximumf %18, %19 : vector<32x32xf32>
    %cst_22 = arith.constant dense<0.000000e+00> : vector<32x32xf32>
    %21 = tpu.matmul %20, %6, %cst_22 {dimension_numbers = #tpu.dot_dimension_numbers<[1], [0], [0], [1], [0, 0, 1, 1], [], []>} : vector<32x32xf32>, vector<32x32xf32>, vector<32x32xf32> -> vector<32x32xf32>
    %22 = vector.broadcast %7 : vector<1x32xf32> to vector<32x32xf32>
    %23 = arith.addf %21, %22 : vector<32x32xf32>
    %cst_23 = arith.constant 0.000000e+00 : f32
    %24 = vector.broadcast %cst_23 : f32 to vector<32x32xf32>
    %25 = arith.maximumf %23, %24 : vector<32x32xf32>
    %cst_24 = arith.constant dense<0.000000e+00> : vector<32x8xf32>
    %26 = tpu.matmul %25, %12, %cst_24 {dimension_numbers = #tpu.dot_dimension_numbers<[1], [0], [0], [1], [0, 0, 1, 1], [], []>} : vector<32x32xf32>, vector<32x8xf32>, vector<32x8xf32> -> vector<32x8xf32>
    %27 = vector.broadcast %13 : vector<1x8xf32> to vector<32x8xf32>
    %28 = arith.addf %26, %27 : vector<32x8xf32>
    %29 = arith.subf %28, %1 : vector<32x8xf32>
    %cst_25 = arith.constant 1.562500e-02 : f32
    %30 = vector.broadcast %cst_25 : f32 to vector<32x8xf32>
    %31 = arith.mulf %30, %29 : vector<32x8xf32>
    %cst_26 = arith.constant 0.000000e+00 : f32
    %32 = vector.broadcast %cst_26 : f32 to vector<32x32xf32>
    %33 = arith.cmpf ogt, %23, %32 : vector<32x32xf32>
    %cst_27 = arith.constant dense<0.000000e+00> : vector<32x32xf32>
    %34 = tpu.matmul %31, %12, %cst_27 {dimension_numbers = #tpu.dot_dimension_numbers<[1], [1], [0], [0], [0, 0, 1, 0], [], []>} : vector<32x8xf32>, vector<32x8xf32>, vector<32x32xf32> -> vector<32x32xf32>
    %cst_28 = arith.constant 0.000000e+00 : f32
    %35 = vector.broadcast %cst_28 : f32 to vector<32x32xf32>
    %36 = arith.select %33, %34, %35 : vector<32x32xi1>, vector<32x32xf32>
    %cst_29 = arith.constant 0.000000e+00 : f32
    %37 = vector.broadcast %cst_29 : f32 to vector<32x32xf32>
    %38 = arith.cmpf ogt, %18, %37 : vector<32x32xf32>
    %cst_30 = arith.constant dense<0.000000e+00> : vector<32x32xf32>
    %39 = tpu.matmul %36, %6, %cst_30 {dimension_numbers = #tpu.dot_dimension_numbers<[1], [1], [0], [0], [0, 0, 1, 0], [], []>} : vector<32x32xf32>, vector<32x32xf32>, vector<32x32xf32> -> vector<32x32xf32>
    %cst_31 = arith.constant 0.000000e+00 : f32
    %40 = vector.broadcast %cst_31 : f32 to vector<32x32xf32>
    %41 = arith.select %38, %39, %40 : vector<32x32xi1>, vector<32x32xf32>
    %cst_32 = arith.constant 0.000000e+00 : f32
    %42 = vector.broadcast %cst_32 : f32 to vector<1x1xf32>
    %43 = vector.extract_strided_slice %25 {offsets = [0, 0], sizes = [16, 32], strides = [1, 1]} : vector<32x32xf32> to vector<16x32xf32>
    %44 = vector.extract_strided_slice %31 {offsets = [0, 0], sizes = [16, 8], strides = [1, 1]} : vector<32x8xf32> to vector<16x8xf32>
    %cst_33 = arith.constant dense<0.000000e+00> : vector<32x8xf32>
    %45 = tpu.matmul %43, %44, %cst_33 {dimension_numbers = #tpu.dot_dimension_numbers<[0], [0], [1], [1], [0, 1, 1, 1], [], []>} : vector<16x32xf32>, vector<16x8xf32>, vector<32x8xf32> -> vector<32x8xf32>
    %46 = vector.extract_strided_slice %31 {offsets = [0, 0], sizes = [16, 8], strides = [1, 1]} : vector<32x8xf32> to vector<16x8xf32>
    %cst_34 = arith.constant dense<0.000000e+00> : vector<8xf32>
    %47 = vector.multi_reduction <add>, %46, %cst_34 [0] : vector<16x8xf32> to vector<8xf32>
    %48 = vector.shape_cast %47 : vector<8xf32> to vector<1x8xf32>
    %49 = vector.extract_strided_slice %20 {offsets = [0, 0], sizes = [16, 32], strides = [1, 1]} : vector<32x32xf32> to vector<16x32xf32>
    %50 = vector.extract_strided_slice %36 {offsets = [0, 0], sizes = [16, 32], strides = [1, 1]} : vector<32x32xf32> to vector<16x32xf32>
    %cst_35 = arith.constant dense<0.000000e+00> : vector<32x32xf32>
    %51 = tpu.matmul %49, %50, %cst_35 {dimension_numbers = #tpu.dot_dimension_numbers<[0], [0], [1], [1], [0, 1, 1, 1], [], []>} : vector<16x32xf32>, vector<16x32xf32>, vector<32x32xf32> -> vector<32x32xf32>
    %52 = vector.extract_strided_slice %36 {offsets = [0, 0], sizes = [16, 32], strides = [1, 1]} : vector<32x32xf32> to vector<16x32xf32>
    %cst_36 = arith.constant dense<0.000000e+00> : vector<32xf32>
    %53 = vector.multi_reduction <add>, %52, %cst_36 [0] : vector<16x32xf32> to vector<32xf32>
    %54 = vector.shape_cast %53 : vector<32xf32> to vector<1x32xf32>
    %55 = vector.extract_strided_slice %0 {offsets = [0, 0], sizes = [16, 8], strides = [1, 1]} : vector<32x8xf32> to vector<16x8xf32>
    %56 = vector.extract_strided_slice %41 {offsets = [0, 0], sizes = [16, 32], strides = [1, 1]} : vector<32x32xf32> to vector<16x32xf32>
    %cst_37 = arith.constant dense<0.000000e+00> : vector<8x32xf32>
    %57 = tpu.matmul %55, %56, %cst_37 {dimension_numbers = #tpu.dot_dimension_numbers<[0], [0], [1], [1], [0, 1, 1, 1], [], []>} : vector<16x8xf32>, vector<16x32xf32>, vector<8x32xf32> -> vector<8x32xf32>
    %58 = vector.extract_strided_slice %41 {offsets = [0, 0], sizes = [16, 32], strides = [1, 1]} : vector<32x32xf32> to vector<16x32xf32>
    %cst_38 = arith.constant dense<0.000000e+00> : vector<32xf32>
    %59 = vector.multi_reduction <add>, %58, %cst_38 [0] : vector<16x32xf32> to vector<32xf32>
    %60 = vector.shape_cast %59 : vector<32xf32> to vector<1x32xf32>
    %61 = arith.mulf %8, %57 : vector<8x32xf32>
    %62 = arith.subf %4, %61 : vector<8x32xf32>
    %63 = arith.mulf %9, %60 : vector<1x32xf32>
    %64 = arith.subf %5, %63 : vector<1x32xf32>
    %65 = arith.mulf %10, %51 : vector<32x32xf32>
    %66 = arith.subf %6, %65 : vector<32x32xf32>
    %67 = arith.mulf %11, %54 : vector<1x32xf32>
    %68 = arith.subf %7, %67 : vector<1x32xf32>
    %69 = arith.mulf %14, %45 : vector<32x8xf32>
    %70 = arith.subf %12, %69 : vector<32x8xf32>
    %71 = arith.mulf %15, %48 : vector<1x8xf32>
    %72 = arith.subf %13, %71 : vector<1x8xf32>
    %73 = vector.extract_strided_slice %2 {offsets = [0, 0], sizes = [16, 8], strides = [1, 1]} : vector<32x8xf32> to vector<16x8xf32>
    %cst_39 = arith.constant dense<0.000000e+00> : vector<16x32xf32>
    %74 = tpu.matmul %73, %62, %cst_39 {dimension_numbers = #tpu.dot_dimension_numbers<[1], [0], [0], [1], [0, 0, 1, 1], [], []>} : vector<16x8xf32>, vector<8x32xf32>, vector<16x32xf32> -> vector<16x32xf32>
    %75 = vector.broadcast %64 : vector<1x32xf32> to vector<16x32xf32>
    %76 = arith.addf %74, %75 : vector<16x32xf32>
    %cst_40 = arith.constant 0.000000e+00 : f32
    %77 = vector.broadcast %cst_40 : f32 to vector<16x32xf32>
    %78 = arith.maximumf %76, %77 : vector<16x32xf32>
    %cst_41 = arith.constant dense<0.000000e+00> : vector<16x32xf32>
    %79 = tpu.matmul %78, %66, %cst_41 {dimension_numbers = #tpu.dot_dimension_numbers<[1], [0], [0], [1], [0, 0, 1, 1], [], []>} : vector<16x32xf32>, vector<32x32xf32>, vector<16x32xf32> -> vector<16x32xf32>
    %80 = vector.broadcast %68 : vector<1x32xf32> to vector<16x32xf32>
    %81 = arith.addf %79, %80 : vector<16x32xf32>
    %cst_42 = arith.constant 0.000000e+00 : f32
    %82 = vector.broadcast %cst_42 : f32 to vector<16x32xf32>
    %83 = arith.maximumf %81, %82 : vector<16x32xf32>
    %cst_43 = arith.constant dense<0.000000e+00> : vector<16x8xf32>
    %84 = tpu.matmul %83, %70, %cst_43 {dimension_numbers = #tpu.dot_dimension_numbers<[1], [0], [0], [1], [0, 0, 1, 1], [], []>} : vector<16x32xf32>, vector<32x8xf32>, vector<16x8xf32> -> vector<16x8xf32>
    %85 = vector.broadcast %72 : vector<1x8xf32> to vector<16x8xf32>
    %86 = arith.addf %84, %85 : vector<16x8xf32>
    %87 = vector.extract_strided_slice %3 {offsets = [0, 0], sizes = [16, 8], strides = [1, 1]} : vector<32x8xf32> to vector<16x8xf32>
    %88 = arith.subf %86, %87 : vector<16x8xf32>
    %89 = arith.mulf %88, %88 : vector<16x8xf32>
    %90 = vector.shape_cast %89 : vector<16x8xf32> to vector<1x16x8xf32>
    %cst_44 = arith.constant dense<0.000000e+00> : vector<1xf32>
    %91 = vector.multi_reduction <add>, %90, %cst_44 [1, 2] : vector<1x16x8xf32> to vector<1xf32>
    %92 = vector.shape_cast %91 : vector<1xf32> to vector<1x1x1xf32>
    %93 = vector.extract %92[0, 0, 0] : f32 from vector<1x1x1xf32>
    %94 = vector.broadcast %93 : f32 to vector<1x1xf32>
    %95 = arith.addf %42, %94 : vector<1x1xf32>
    %96 = vector.extract_strided_slice %25 {offsets = [16, 0], sizes = [16, 32], strides = [1, 1]} : vector<32x32xf32> to vector<16x32xf32>
    %97 = vector.extract_strided_slice %31 {offsets = [16, 0], sizes = [16, 8], strides = [1, 1]} : vector<32x8xf32> to vector<16x8xf32>
    %cst_45 = arith.constant dense<0.000000e+00> : vector<32x8xf32>
    %98 = tpu.matmul %96, %97, %cst_45 {dimension_numbers = #tpu.dot_dimension_numbers<[0], [0], [1], [1], [0, 1, 1, 1], [], []>} : vector<16x32xf32>, vector<16x8xf32>, vector<32x8xf32> -> vector<32x8xf32>
    %99 = vector.extract_strided_slice %31 {offsets = [16, 0], sizes = [16, 8], strides = [1, 1]} : vector<32x8xf32> to vector<16x8xf32>
    %cst_46 = arith.constant dense<0.000000e+00> : vector<8xf32>
    %100 = vector.multi_reduction <add>, %99, %cst_46 [0] : vector<16x8xf32> to vector<8xf32>
    %101 = vector.shape_cast %100 : vector<8xf32> to vector<1x8xf32>
    %102 = vector.extract_strided_slice %20 {offsets = [16, 0], sizes = [16, 32], strides = [1, 1]} : vector<32x32xf32> to vector<16x32xf32>
    %103 = vector.extract_strided_slice %36 {offsets = [16, 0], sizes = [16, 32], strides = [1, 1]} : vector<32x32xf32> to vector<16x32xf32>
    %cst_47 = arith.constant dense<0.000000e+00> : vector<32x32xf32>
    %104 = tpu.matmul %102, %103, %cst_47 {dimension_numbers = #tpu.dot_dimension_numbers<[0], [0], [1], [1], [0, 1, 1, 1], [], []>} : vector<16x32xf32>, vector<16x32xf32>, vector<32x32xf32> -> vector<32x32xf32>
    %105 = vector.extract_strided_slice %36 {offsets = [16, 0], sizes = [16, 32], strides = [1, 1]} : vector<32x32xf32> to vector<16x32xf32>
    %cst_48 = arith.constant dense<0.000000e+00> : vector<32xf32>
    %106 = vector.multi_reduction <add>, %105, %cst_48 [0] : vector<16x32xf32> to vector<32xf32>
    %107 = vector.shape_cast %106 : vector<32xf32> to vector<1x32xf32>
    %108 = vector.extract_strided_slice %0 {offsets = [16, 0], sizes = [16, 8], strides = [1, 1]} : vector<32x8xf32> to vector<16x8xf32>
    %109 = vector.extract_strided_slice %41 {offsets = [16, 0], sizes = [16, 32], strides = [1, 1]} : vector<32x32xf32> to vector<16x32xf32>
    %cst_49 = arith.constant dense<0.000000e+00> : vector<8x32xf32>
    %110 = tpu.matmul %108, %109, %cst_49 {dimension_numbers = #tpu.dot_dimension_numbers<[0], [0], [1], [1], [0, 1, 1, 1], [], []>} : vector<16x8xf32>, vector<16x32xf32>, vector<8x32xf32> -> vector<8x32xf32>
    %111 = vector.extract_strided_slice %41 {offsets = [16, 0], sizes = [16, 32], strides = [1, 1]} : vector<32x32xf32> to vector<16x32xf32>
    %cst_50 = arith.constant dense<0.000000e+00> : vector<32xf32>
    %112 = vector.multi_reduction <add>, %111, %cst_50 [0] : vector<16x32xf32> to vector<32xf32>
    %113 = vector.shape_cast %112 : vector<32xf32> to vector<1x32xf32>
    %114 = arith.mulf %8, %110 : vector<8x32xf32>
    %115 = arith.subf %4, %114 : vector<8x32xf32>
    %116 = arith.mulf %9, %113 : vector<1x32xf32>
    %117 = arith.subf %5, %116 : vector<1x32xf32>
    %118 = arith.mulf %10, %104 : vector<32x32xf32>
    %119 = arith.subf %6, %118 : vector<32x32xf32>
    %120 = arith.mulf %11, %107 : vector<1x32xf32>
    %121 = arith.subf %7, %120 : vector<1x32xf32>
    %122 = arith.mulf %14, %98 : vector<32x8xf32>
    %123 = arith.subf %12, %122 : vector<32x8xf32>
    %124 = arith.mulf %15, %101 : vector<1x8xf32>
    %125 = arith.subf %13, %124 : vector<1x8xf32>
    %126 = vector.extract_strided_slice %2 {offsets = [16, 0], sizes = [16, 8], strides = [1, 1]} : vector<32x8xf32> to vector<16x8xf32>
    %cst_51 = arith.constant dense<0.000000e+00> : vector<16x32xf32>
    %127 = tpu.matmul %126, %115, %cst_51 {dimension_numbers = #tpu.dot_dimension_numbers<[1], [0], [0], [1], [0, 0, 1, 1], [], []>} : vector<16x8xf32>, vector<8x32xf32>, vector<16x32xf32> -> vector<16x32xf32>
    %128 = vector.broadcast %117 : vector<1x32xf32> to vector<16x32xf32>
    %129 = arith.addf %127, %128 : vector<16x32xf32>
    %cst_52 = arith.constant 0.000000e+00 : f32
    %130 = vector.broadcast %cst_52 : f32 to vector<16x32xf32>
    %131 = arith.maximumf %129, %130 : vector<16x32xf32>
    %cst_53 = arith.constant dense<0.000000e+00> : vector<16x32xf32>
    %132 = tpu.matmul %131, %119, %cst_53 {dimension_numbers = #tpu.dot_dimension_numbers<[1], [0], [0], [1], [0, 0, 1, 1], [], []>} : vector<16x32xf32>, vector<32x32xf32>, vector<16x32xf32> -> vector<16x32xf32>
    %133 = vector.broadcast %121 : vector<1x32xf32> to vector<16x32xf32>
    %134 = arith.addf %132, %133 : vector<16x32xf32>
    %cst_54 = arith.constant 0.000000e+00 : f32
    %135 = vector.broadcast %cst_54 : f32 to vector<16x32xf32>
    %136 = arith.maximumf %134, %135 : vector<16x32xf32>
    %cst_55 = arith.constant dense<0.000000e+00> : vector<16x8xf32>
    %137 = tpu.matmul %136, %123, %cst_55 {dimension_numbers = #tpu.dot_dimension_numbers<[1], [0], [0], [1], [0, 0, 1, 1], [], []>} : vector<16x32xf32>, vector<32x8xf32>, vector<16x8xf32> -> vector<16x8xf32>
    %138 = vector.broadcast %125 : vector<1x8xf32> to vector<16x8xf32>
    %139 = arith.addf %137, %138 : vector<16x8xf32>
    %140 = vector.extract_strided_slice %3 {offsets = [16, 0], sizes = [16, 8], strides = [1, 1]} : vector<32x8xf32> to vector<16x8xf32>
    %141 = arith.subf %139, %140 : vector<16x8xf32>
    %142 = arith.mulf %141, %141 : vector<16x8xf32>
    %143 = vector.shape_cast %142 : vector<16x8xf32> to vector<1x16x8xf32>
    %cst_56 = arith.constant dense<0.000000e+00> : vector<1xf32>
    %144 = vector.multi_reduction <add>, %143, %cst_56 [1, 2] : vector<1x16x8xf32> to vector<1xf32>
    %145 = vector.shape_cast %144 : vector<1xf32> to vector<1x1x1xf32>
    %146 = vector.extract %145[0, 0, 0] : f32 from vector<1x1x1xf32>
    %147 = vector.broadcast %146 : f32 to vector<1x1xf32>
    %148 = arith.addf %95, %147 : vector<1x1xf32>
    %cst_57 = arith.constant 3.906250e-03 : f32
    %149 = vector.broadcast %cst_57 : f32 to vector<1x1xf32>
    %150 = arith.mulf %148, %149 : vector<1x1xf32>
    %c0_58 = arith.constant 0 : index
    %c0_59 = arith.constant 0 : index
    %151 = vector.load %arg3[%c0_58, %c0_59] : memref<1x1xf32, #tpu.memory_space<vmem>>, vector<1x1xf32>
    tpu.vector_store %arg3[%c0_58, %c0_59], %150 {strides = array<i32>} : memref<1x1xf32, #tpu.memory_space<vmem>>, vector<1x1xf32>,
    return
  }
}

</mosaic_0001>

<bundles_post_ra>
// kernel: metasgd_forward.1
= control target key start
LH: loop header
LB: loop body
LE: loop exit
PB: predicated region body
PF: predicated region fallthrough
CT: control target
= control target key end

     0   :  { %vm59_vm0 = vcmask 64512   ;;  %s2966_s0 = inlined_call_operand.vmem [shape: f32[128,8], index: 0, kind: input, shape index: {}]   ;;  %s2967_s1 = inlined_call_operand.vmem [shape: f32[112,32], index: 1, kind: input, shape index: {}]   ;;  %s2968_s2 = inlined_call_operand.vmem [shape: f32[80,8], index: 2, kind: input, shape index: {}]   ;;  %s2969_s3 = inlined_call_operand.hbm [shape: f32[1,1], index: 3, kind: output, shape index: {}]  }
   0x1   :  { %v2504_v0 = vld [vmem:[%s2967_s1] sm:$0xff]  ;;  %v16_v2 = vld [vmem:[%s2966_s0 + $0x8] sm:$0xff]  ;;  %v2517_v3 = vld [vmem:[%s2966_s0 + $0x10] sm:$0xff] }
   0x2   :  { %v15_v1 = vld [vmem:[%s2966_s0] sm:$0xff]  ;;  %2173 = vmatprep.subr.mxu0 %v2504_v0  ;;  %v2522_v4 = vld [vmem:[%s2967_s1 + $0x10] sm:$0xff]  ;;  %v2528_v5 = vld [vmem:[%s2967_s1 + $0x18] sm:$0xff] }
   0x3   :  { %2175 = vmatprep.mubr.msk.f32.mxu0 %vm59_vm0, %v15_v1  ;;  %2174 = vmatpush3.msra.mxu0 %v2504_v0  ;;  %v2533_v6 = vpack.c.bf16 %v2528_v5, %v2522_v4 }
   0x4   :  { %887 = vxpose.xlu1.b32.start [1/2] (short) (narrow) %v15_v1, 8  ;;  %2176 = vmatmul.mubr.msk.f32.vlgmr.msra.gmra.mrb[0].mxu0 %vm59_vm0, %v16_v2 }
   0x5   :  { %8 = vsyncpa [#allocation3], 0  ;;  %2178 = vmatprep.mubr.msk.f32.mxu0 %vm59_vm0, %v2517_v3  ;;  %v2540_v7 = vld [vmem:[%s2966_s0 + $0x18] sm:$0xff]  ;;  %2346 = vmatprep.subr.bf16.mxu1 %v2533_v6  ;;  %v2549_v8 = vld [vmem:[%s2967_s1 + $0x20] sm:$0xff]  ;;  %v55_v14 = vlaneseq  ;;  %vm165_vm1 = vcmask 261120   ;;  %vm642_vm7 = vcmask 130048  }
   0x6   :  { %2348 = vmatpush3.bf16.msra.mxu1 %v2533_v6  ;;  %v2554_v9 = vld [vmem:[%s2967_s1 + $0x28] sm:$0xff]  ;;  %v2565_v11 = vld [vmem:[%s2968_s2] sm:$0xff]  ;;  %v2602_v31 = vld [vmem:[%s2968_s2 + $0x10] sm:$0xff]  ;;  %vm2478_vm10 = vmmov 0   ;;  %s2480_s10 = smov [#allocation2]  }
   0x7   :  { %v2558_v10 = vpack.c.bf16 %v2554_v9, %v2549_v8  ;;  %v2570_v12 = vld [vmem:[%s2968_s2 + $0x8] sm:$0xff]  ;;  %v56_v15 = vshrl.u32 %v55_v14, 7  ;;  %v2607_v32 = vld [vmem:[%s2968_s2 + $0x18] sm:$0xff]  ;;  %vm2362_vm2 = vmpackc.low %vm59_vm0, %vm59_vm0  ;;  %s2002_s11 = sshll.u32 %s2480_s10, 4  ;;  %s2003_s11 = int_to_ptr.vmem [resolvable:$true] %s2002_s11 }
   0x8   :  { %888 = vxpose.xlu1.b32.end [2/2] (short) (narrow) %v16_v2, 8  ;;  %2179 = vmatmul.mubr.msk.f32.gmra.mrb[2].mxu0 %vm59_vm0, %v2540_v7  ;;  %v2353_v13 = vpack.c.bf16 %v2570_v12, %v2565_v11  ;;  %v2579_v17 = vld [vmem:[%s2967_s1 + $0x8] sm:$0x1]  ;;  %v2357_v33 = vpack.c.bf16 %v2607_v32, %v2602_v31  ;;  %v2616_v34 = vld [vmem:[%s2967_s1 + $0x30] sm:$0x1]  ;;  %vm2374_vm6 = vmpackc.low %vm165_vm1, %vm165_vm1  ;;  %s2453_s12 = scalar_lea.vmem %s2003_s11, 16  ;;  %p2458_p1 = scmp.lt.s32.totalorder %s2003_s11, %s2003_s11 }
   0x9   :  { %2350 = vmatprep.subr.bf16.mxu1 %v2558_v10  ;;  %v2574_v16 = vsub.s32 0, %v56_v15  ;;  %v2657_v49 = vld [vmem:[%s2968_s2 + $0x20] sm:$0x1]  ;;  %v20_v51 = vld [vmem:[%s2966_s0 + $0x28] sm:$0xff]  ;;  %v22_v59 = vld [vmem:[%s2966_s0 + $0x38] sm:$0xff]  ;;  %p2454_p0 = scmp.ne.s32.totalorder %s2003_s11, %s2453_s12  ;;  %s2457_s13 = scalar_lea.vmem %s2003_s11, 32 }
   0xa   :  { %2352 = vmatpush3.bf16.msra.mxu1 %v2558_v10  ;;  %2354 = vmatprep.subr.bf16.mxu0 %v2353_v13  ;;  %v19_v54 = vld [vmem:[%s2966_s0 + $0x20] sm:$0xff]  ;;  %v21_v63 = vld [vmem:[%s2966_s0 + $0x30] sm:$0xff]  ;;  %p2459_p2 = scmp.lt.s32.totalorder %s2457_s13, %s2453_s12 }
   0xb   :  { %2356 = vmatpush3.bf16.msra.mxu0 %v2353_v13  ;;  %v58_v18 = vrot.slane %v2579_v17, %v2574_v16  ;;  %2363 = vmatprep.subr.msk.bf16.mxu1 %vm2362_vm2, %v2353_v13  ;;  %v164_v35 = vrot.slane %v2616_v34, %v2574_v16  ;;  %v270_v50 = vrot.slane %v2657_v49, %v2574_v16 }
   0xc   :  { %2358 = vmatprep.subr.bf16.mxu0 %v2357_v33  ;;  %p2460_p3 = por %p2459_p2, %p2458_p1 }
   0xe   :  { %p2461_p4 = pnand %p2460_p3, %p2454_p0 }
   0xf   :  { %2360 = vmatpush3.bf16.msra.mxu0 %v2357_v33 }
  0x10   :  { %2375 = vmatprep.subr.msk.bf16.mxu0 %vm2374_vm6, %v2533_v6 }
  0xd7   :  { %v2177_v19 = vpop.f32.mrb[0].mxu0 }
  0xd8   :  { %v2583_v20 = vadd.f32 %v2177_v19, %v58_v18  ;;  %v138_v21 = vpop.f32.mrb[1].mxu0 }
  0xd9   :  { %v2585_v22 = vadd.f32 %v138_v21, %v58_v18 }
  0xda   :  { %v158_v25 = vmax.f32 %v2583_v20, 0.0  ;;  %vm494_vm11 = vcmp.gt.f32.partialorder %v2583_v20, 0.0  ;;  %v903_v20 = vpop.trf.xlu1 }
  0xdb   :  { %v2180_v23 = vpop.f32.mrb[2].mxu0  ;;  %v157_v24 = vmax.f32 %v2585_v22, 0.0  ;;  %vm493_vm12 = vcmp.gt.f32.partialorder %v2585_v22, 0.0 }
  0xdc   :  { %v2589_v26 = vadd.f32 %v2180_v23, %v58_v18  ;;  %v148_v27 = vpop.f32.mrb[3].mxu0  ;;  %vm2397_vm13 = vmpackc.low %vm494_vm11, %vm493_vm12 }
  0xdd   :  { %v2591_v28 = vadd.f32 %v148_v27, %v58_v18  ;;  %2189 = vmatprep.mubr.msk.f32.mxu1 %vm165_vm1, %v157_v24 }
  0xde   :  { %v160_v29 = vmax.f32 %v2589_v26, 0.0  ;;  %2190 = vmatmul.mubr.msk.f32.vlgmr.msra.gmra.mrb[0].mxu1 %vm165_vm1, %v158_v25  ;;  %vm496_vm14 = vcmp.gt.f32.partialorder %v2589_v26, 0.0 }
  0xdf   :  { %v159_v30 = vmax.f32 %v2591_v28, 0.0  ;;  %2366 = vmatpush3.bf16.xpose.msk.msra.mxu1 %vm2362_vm2, %v2353_v13  ;;  %vm495_vm15 = vcmp.gt.f32.partialorder %v2591_v28, 0.0 }
  0xe0   :  { %2369 = vmatprep.subr.msk.bf16.mxu1 %vm2362_vm2, %v2357_v33 }
  0xe1   :  { %2192 = vmatprep.mubr.msk.f32.mxu1 %vm165_vm1, %v159_v30 }
  0xe2   :  { %2193 = vmatmul.mubr.msk.f32.gmra.mrb[2].mxu1 %vm165_vm1, %v160_v29 }
  0xe7   :  { %2372 = vmatpush3.bf16.xpose.msk.msra.mxu1 %vm2362_vm2, %v2357_v33 }
 0x1b1   :  { %v2191_v36 = vpop.f32.mrb[0].mxu1 }
 0x1b2   :  { %v2620_v37 = vadd.f32 %v2191_v36, %v164_v35  ;;  %v244_v38 = vpop.f32.mrb[1].mxu1 }
 0x1b3   :  { %v2622_v39 = vadd.f32 %v244_v38, %v164_v35 }
 0x1b4   :  { %vm377_vm3 = vcmp.gt.f32.partialorder %v2620_v37, 0.0  ;;  %v264_v42 = vmax.f32 %v2620_v37, 0.0 }
 0x1b5   :  { %vm376_vm4 = vcmp.gt.f32.partialorder %v2622_v39, 0.0  ;;  %v2194_v40 = vpop.f32.mrb[2].mxu1  ;;  %v263_v41 = vmax.f32 %v2622_v39, 0.0 }
 0x1b6   :  { %v2628_v43 = vadd.f32 %v2194_v40, %v164_v35  ;;  %v254_v44 = vpop.f32.mrb[3].mxu1  ;;  %vm2634_vm5 = vmpackc.low %vm377_vm3, %vm376_vm4 }
 0x1b7   :  { %v2638_v46 = vadd.f32 %v254_v44, %v164_v35  ;;  %610 = vxpose.xlu0.b32.start [1/2] (short) (narrow) %v263_v41, 32  ;;  %2203 = vmatprep.mubr.msk.f32.mxu0 %vm165_vm1, %v263_v41 }
 0x1b8   :  { %v266_v47 = vmax.f32 %v2628_v43, 0.0  ;;  %2204 = vmatmul.mubr.msk.f32.vlgmr.msra.gmra.mrb[4].mxu0 %vm165_vm1, %v264_v42  ;;  %vm379_vm8 = vcmp.gt.f32.partialorder %v2628_v43, 0.0 }
 0x1b9   :  { %v265_v48 = vmax.f32 %v2638_v46, 0.0  ;;  %2378 = vmatpush3.bf16.xpose.msk.msra.mxu0 %vm2374_vm6, %v2533_v6  ;;  %vm378_vm9 = vcmp.gt.f32.partialorder %v2638_v46, 0.0 }
 0x1ba   :  { %2381 = vmatprep.subr.msk.bf16.mxu0 %vm2374_vm6, %v2558_v10  ;;  %vm2843_vm2 = vmpackc.low %vm379_vm8, %vm378_vm9 }
 0x1bb   :  { %611 = vxpose.xlu0.b32.end [2/2] (short) (narrow) %v264_v42, 32  ;;  %2206 = vmatprep.mubr.msk.f32.mxu0 %vm165_vm1, %v265_v48 }
 0x1bc   :  { %2207 = vmatmul.mubr.msk.f32.gmra.mrb[6].mxu0 %vm165_vm1, %v266_v47  ;;  %1302 = vxpose.xlu1.b32.start [1/2] (short) (narrow) %v265_v48, 32 }
 0x1c0   :  { %1303 = vxpose.xlu1.b32.end [2/2] (short) (narrow) %v266_v47, 32 }
 0x1c1   :  { %2384 = vmatpush3.bf16.xpose.msk.msra.mxu0 %vm2374_vm6, %v2558_v10 }
 0x1c4   :  { %749 = vxpose.xlu0.b32.start [1/2] (short) (narrow) %v157_v24, 32 }
 0x1c8   :  { %750 = vxpose.xlu0.b32.end [2/2] (short) (narrow) %v158_v25, 32 }
 0x1c9   :  { %1578 = vxpose.xlu1.b32.start [1/2] (short) (narrow) %v2517_v3, 8 }
 0x1cd   :  { %1579 = vxpose.xlu1.b32.end [2/2] (short) (narrow) %v2540_v7, 8 }
 0x1d1   :  { %1440 = vxpose.xlu0.b32.start [1/2] (short) (narrow) %v159_v30, 32 }
 0x1d5   :  { %1441 = vxpose.xlu0.b32.end [2/2] (short) (narrow) %v160_v29, 32 }
 0x237   :  { %v626_v21 = vpop.trf.xlu0 }
 0x23b   :  { %v627_v23 = vpop.trf.xlu0 }
 0x23c   :  { %v1318_v46 = vpop.trf.xlu1 }
 0x23f   :  { %v628_v24 = vpop.trf.xlu0 }
 0x243   :  { %v629_v25 = vpop.trf.xlu0 }
 0x247   :  { %v765_v27 = vpop.trf.xlu0 }
 0x24b   :  { %v766_v35 = vpop.trf.xlu0 }
 0x28b   :  { %v2205_v52 = vpop.f32.mrb[4].mxu0 }
 0x28c   :  { %v355_v53 = vadd.f32 %v2205_v52, %v270_v50  ;;  %v349_v55 = vpop.f32.mrb[5].mxu0  ;;  %v767_v52 = vpop.trf.xlu0 }
 0x28d   :  { %v350_v56 = vadd.f32 %v349_v55, %v270_v50 }
 0x28e   :  { %v369_v57 = vsub.f32 %v355_v53, %v20_v51 }
 0x28f   :  { %v368_v58 = vsub.f32 %v350_v56, %v19_v54  ;;  %v2208_v60 = vpop.f32.mrb[6].mxu0 }
 0x290   :  { %v373_v61 = vmul.f32 0.015625, %v369_v57  ;;  %v365_v62 = vadd.f32 %v2208_v60, %v270_v50  ;;  %v359_v1 = vpop.f32.mrb[7].mxu0  ;;  %v768_v55 = vpop.trf.xlu0  ;;  %v2724_v60 = vld [vmem:[%s2967_s1 + $0x68] sm:$0x1] }
 0x291   :  { %v372_v2 = vmul.f32 0.015625, %v368_v58  ;;  %v360_v3 = vadd.f32 %v359_v1, %v270_v50 }
 0x292   :  { %v741_v6 = vsel %vm59_vm0, %v373_v61, 0.0  ;;  %v371_v7 = vsub.f32 %v365_v62, %v22_v59  ;;  %v2477_v62 = vmov 0.0|0.0  }
 0x293   :  { %v740_v10 = vsel %vm59_vm0, %v372_v2, 0.0  ;;  %v370_v13 = vsub.f32 %v360_v3, %v21_v63  ;;  %2217 = vmatprep.mubr.msk.f32.mxu1 %vm59_vm0, %v372_v2  ;;  %v2385_v14 = vpack.c.bf16 %v373_v61, %v372_v2  ;;  %v2479_v63 = vmov 0.0  }
 0x294   :  { %v2676_v15 = vadd.f32 %v741_v6, %v740_v10  ;;  %v2678_v18 = vmul.f32 0.015625, %v371_v7  ;;  %2218 = vmatmul.mubr.msk.f32.vlgmr.msra.gmra.mrb[4].mxu1 %vm59_vm0, %v373_v61 }
 0x295   :  { %v2681_v19 = vmul.f32 0.015625, %v370_v13  ;;  %2386 = vmatprep.subr.bf16.mxu1 %v2385_v14 }
 0x296   :  { %2388 = vmatpush3.bf16.msra.mxu1 %v2385_v14 }
 0x297   :  { %2220 = vmatprep.mubr.msk.f32.mxu1 %vm59_vm0, %v2681_v19  ;;  %2395 = vmatprep.subr.bf16.mxu1 %v2477_v62 }
 0x298   :  { %2221 = vmatmul.mubr.msk.f32.gmra.mrb[6].mxu1 %vm59_vm0, %v2678_v18 }
 0x299   :  { %2241 = vmatprep.mubr.msk.f32.mxu1 %vm642_vm7, %v626_v21 }
 0x29c   :  { %2242 = vmatmul.mubr.msk.f32.vlgmr.msra.gmra.mrb[8].mxu1 %vm642_vm7, %v627_v23 }
 0x29d   :  { %2244 = vmatprep.mubr.msk.f32.mxu1 %vm642_vm7, %v628_v24 }
 0x2a0   :  { %2245 = vmatmul.mubr.msk.f32.gmra.mrb[10].mxu1 %vm642_vm7, %v629_v25 }
 0x2a1   :  { %2261 = vmatprep.mubr.msk.f32.mxu1 %vm2478_vm10, %v2479_v63 }
 0x367   :  { %v2219_v29 = vpop.f32.mrb[4].mxu1 }
 0x368   :  { %v490_v30 = vsel %vm377_vm3, %v2219_v29, 0.0  ;;  %v470_v33 = vpop.f32.mrb[5].mxu1  ;;  %vm2427_vm3 = vmpackc.low %vm496_vm14, %vm495_vm15 }
 0x369   :  { %v879_v36 = vsel %vm165_vm1, %v490_v30, 0.0  ;;  %v489_v38 = vsel %vm376_vm4, %v470_v33, 0.0  ;;  %v2389_v40 = vpack.c.bf16 %v2219_v29, %v470_v33 }
 0x36a   :  { %v878_v41 = vsel %vm165_vm1, %v489_v38, 0.0  ;;  %2231 = vmatprep.mubr.msk.f32.mxu0 %vm165_vm1, %v489_v38 }
 0x36b   :  { %v2699_v42 = vadd.f32 %v879_v36, %v878_v41  ;;  %v2222_v44 = vpop.f32.mrb[6].mxu1  ;;  %2232 = vmatmul.mubr.msk.f32.vlgmr.msra.gmra.mrb[8].mxu0 %vm165_vm1, %v490_v30  ;;  %2391 = vmatprep.subr.msk.bf16.mxu0 %vm2634_vm5, %v2389_v40  ;;  %v2760_v36 = vld [vmem:[%s2967_s1 + $0x50] sm:$0xff] }
 0x36c   :  { %v492_v37 = vsel %vm379_vm8, %v2222_v44, 0.0  ;;  %v480_v39 = vpop.f32.mrb[7].mxu1  ;;  %2394 = vmatpush3.bf16.msk.msra.mxu0 %vm2634_vm5, %v2389_v40  ;;  %v2767_v40 = vld [vmem:[%s2967_s1 + $0x48] sm:$0xff] }
 0x36d   :  { %v1570_v47 = vsel %vm165_vm1, %v492_v37, 0.0  ;;  %v491_v48 = vsel %vm378_vm9, %v480_v39, 0.0  ;;  %v2712_v50 = vpack.c.bf16 %v2222_v44, %v480_v39  ;;  %v881_v28 = vrot.slane %v2699_v42, 4 }
 0x36e   :  { %v1569_v51 = vsel %vm165_vm1, %v491_v48, 0.0  ;;  %2234 = vmatprep.mubr.msk.f32.mxu0 %vm165_vm1, %v491_v48 }
 0x36f   :  { %v1571_v53 = vadd.f32 %v1570_v47, %v1569_v51  ;;  %2235 = vmatmul.mubr.msk.f32.gmra.mrb[10].mxu0 %vm165_vm1, %v492_v37  ;;  %v2243_v1 = vpop.f32.mrb[8].mxu1  ;;  %v2774_v51 = vld [vmem:[%s2967_s1 + $0x60] sm:$0xff]  ;;  %v882_v26 = vadd.f32 %v881_v28, %v2699_v42 }
 0x370   :  { %2251 = vmatprep.mubr.msk.f32.mxu0 %vm642_vm7, %v765_v27  ;;  %v721_v2 = vpop.f32.mrb[9].mxu1 }
 0x371   :  { %v1572_v54 = vrot.slane %v1571_v53, 4 }
 0x373   :  { %v1573_v45 = vadd.f32 %v1572_v54, %v1571_v53  ;;  %2252 = vmatmul.mubr.msk.f32.vlgmr.msra.gmra.mrb[12].mxu0 %vm642_vm7, %v766_v35  ;;  %v2732_v3 = vpop.f32.mrb[10].mxu1  ;;  %v2780_v53 = vld [vmem:[%s2967_s1 + $0x58] sm:$0xff] }
 0x374   :  { %2254 = vmatprep.mubr.msk.f32.mxu0 %vm642_vm7, %v767_v52  ;;  %v2734_v6 = vpop.f32.mrb[11].mxu1 }
 0x375   :  { %v1574_v56 = vrot.slane %v1573_v45, 2 }
 0x377   :  { %v1575_v57 = vadd.f32 %v1574_v56, %v1573_v45  ;;  %2255 = vmatmul.mubr.msk.f32.gmra.mrb[14].mxu0 %vm642_vm7, %v768_v55 }
 0x379   :  { %v1576_v58 = vrot.slane %v1575_v57, 1 }
 0x37b   :  { %v1577_v59 = vadd.f32 %v1576_v58, %v1575_v57 }
 0x37d   :  { %v2727_v61 = vmul.f32 %v1577_v59, %v2724_v60 }
 0x43e   :  { %v2233_v7 = vpop.f32.mrb[8].mxu0 }
 0x43f   :  { %v607_v10 = vsel %vm494_vm11, %v2233_v7, 0.0  ;;  %v587_v13 = vpop.f32.mrb[9].mxu0 }
 0x440   :  { %v993_v14 = vsel %vm165_vm1, %v607_v10, 0.0  ;;  %v606_v21 = vsel %vm493_vm12, %v587_v13, 0.0  ;;  %v2396_v23 = vpack.c.bf16 %v2233_v7, %v587_v13 }
 0x441   :  { %v992_v24 = vsel %vm165_vm1, %v606_v21, 0.0 }
 0x442   :  { %v2741_v25 = vadd.f32 %v993_v14, %v992_v24  ;;  %v2743_v27 = vpop.f32.mrb[10].mxu0  ;;  %2398 = vmatpush3.bf16.msk.msra.mxu1 %vm2397_vm13, %v2396_v23  ;;  %v2415_v24 = vpack.c.bf16 %v2678_v18, %v2681_v19 }
 0x443   :  { %v609_v22 = vsel %vm496_vm14, %v2743_v27, 0.0  ;;  %v2749_v29 = vpop.f32.mrb[11].mxu0 }
 0x444   :  { %v1684_v30 = vsel %vm165_vm1, %v609_v22, 0.0  ;;  %v608_v33 = vsel %vm495_vm15, %v2749_v29, 0.0  ;;  %v2426_v35 = vpack.c.bf16 %v2743_v27, %v2749_v29  ;;  %v39_v22 = vld [vmem:[%s2967_s1 + $0x40] sm:$0x1]  ;;  %v1456_v29 = vpop.trf.xlu0 }
 0x445   :  { %v1683_v38 = vsel %vm165_vm1, %v608_v33, 0.0  ;;  %2262 = vmatmul.mubr.msk.f32.vlgmr.msra.gmra.mrb[12].mxu1 %vm642_vm7, %v903_v20  ;;  %v2797_v33 = vld [vmem:[%s2968_s2 + $0x30] sm:$0xff] }
 0x446   :  { %v1685_v41 = vadd.f32 %v1684_v30, %v1683_v38  ;;  %v2253_v44 = vpop.f32.mrb[12].mxu0  ;;  %v2802_v38 = vld [vmem:[%s2968_s2 + $0x28] sm:$0xff] }
 0x447   :  { %v1006_v37 = vmul.f32 %v2253_v44, %v2760_v36  ;;  %v859_v39 = vpop.f32.mrb[13].mxu0  ;;  %v1015_v44 = vmul.f32 %v721_v2, %v2802_v38 }
 0x448   :  { %v1686_v47 = vrot.slane %v1685_v41, 4  ;;  %v1005_v48 = vmul.f32 %v859_v39, %v2767_v40 }
 0x449   :  { %v1010_v52 = vsub.f32 %v2528_v5, %v1006_v37  ;;  %v1019_v39 = vsub.f32 %v2565_v11, %v1015_v44 }
 0x44a   :  { %v1687_v54 = vadd.f32 %v1686_v47, %v1685_v41  ;;  %v1009_v45 = vsub.f32 %v2522_v4, %v1005_v48  ;;  %v2256_v55 = vpop.f32.mrb[14].mxu0  ;;  %v1016_v41 = vmul.f32 %v2243_v1, %v2797_v33  ;;  %v2811_v47 = vld [vmem:[%s2968_s2 + $0x40] sm:$0xff]  ;;  %v2816_v48 = vld [vmem:[%s2968_s2 + $0x38] sm:$0xff] }
 0x44b   :  { %v1008_v56 = vmul.f32 %v2256_v55, %v2774_v51  ;;  %v869_v57 = vpop.f32.mrb[15].mxu0  ;;  %v1017_v1 = vmul.f32 %v2734_v6, %v2816_v48 }
 0x44c   :  { %v1688_v58 = vrot.slane %v1687_v54, 2  ;;  %v1007_v59 = vmul.f32 %v869_v57, %v2780_v53  ;;  %v2399_v7 = vpack.c.bf16 %v1010_v52, %v1009_v45  ;;  %v1020_v37 = vsub.f32 %v2570_v12, %v1016_v41  ;;  %v2831_v57 = vld [vmem:[%s2967_s1 + $0x38] sm:$0xff] }
 0x44d   :  { %v1012_v10 = vsub.f32 %v2554_v9, %v1008_v56  ;;  %v1018_v52 = vmul.f32 %v2732_v3, %v2811_v47  ;;  %v1021_v45 = vsub.f32 %v2602_v31, %v1017_v1  ;;  %v23_v56 = vld [vmem:[%s2966_s0 + $0x40] sm:$0xff] }
 0x44e   :  { %v1689_v13 = vadd.f32 %v1688_v58, %v1687_v54  ;;  %v1011_v14 = vsub.f32 %v2549_v8, %v1007_v59  ;;  %2400 = vmatprep.subr.bf16.mxu1 %v2399_v7  ;;  %v2407_v2 = vpack.c.bf16 %v1020_v37, %v1019_v39  ;;  %2266 = vmatprep.mubr.msk.f32.mxu0 %vm59_vm0, %v23_v56  ;;  %v1319_v37 = vpop.trf.xlu1 }
 0x44f   :  { %2402 = vmatpush3.bf16.msra.mxu1 %v2399_v7  ;;  %v1022_v54 = vsub.f32 %v2607_v32, %v1018_v52  ;;  %v24_v7 = vld [vmem:[%s2966_s0 + $0x48] sm:$0xff] }
 0x450   :  { %v1690_v21 = vrot.slane %v1689_v13, 1  ;;  %v2403_v23 = vpack.c.bf16 %v1012_v10, %v1011_v14 }
 0x451   :  { %v2411_v55 = vpack.c.bf16 %v1022_v54, %v1021_v45 }
 0x452   :  { %2404 = vmatprep.subr.bf16.mxu1 %v2403_v23  ;;  %v1691_v20 = vadd.f32 %v1690_v21, %v1689_v13  ;;  %v995_v13 = vrot.slane %v2741_v25, 4 }
 0x453   :  { %2406 = vmatpush3.bf16.msra.mxu1 %v2403_v23 }
 0x454   :  { %2416 = vmatprep.subr.bf16.mxu1 %v2415_v24  ;;  %v2792_v30 = vmul.f32 %v1691_v20, %v39_v22  ;;  %v996_v14 = vadd.f32 %v995_v13, %v2741_v25 }
 0x456   :  { %v997_v21 = vrot.slane %v996_v14, 2 }
 0x458   :  { %v998_v23 = vadd.f32 %v997_v21, %v996_v14 }
 0x45a   :  { %v999_v20 = vrot.slane %v998_v23, 1 }
 0x45c   :  { %v1000_v41 = vadd.f32 %v999_v20, %v998_v23 }
 0x45e   :  { %v1003_v44 = vmul.f32 %v1000_v41, %v39_v22 }
 0x460   :  { %v1004_v43 = vsub.f32 %v2579_v17, %v1003_v44 }
 0x462   :  { %v1028_v39 = vrot.slane %v1004_v43, %v2574_v16 }
 0x518   :  { %v988_v3 = vpop.f32.mrb[12].mxu1 }
 0x519   :  { %v1001_v6 = vmul.f32 %v988_v3, %v2831_v57  ;;  %v2263_v58 = vpop.f32.mrb[13].mxu1 }
 0x51b   :  { %v1002_v59 = vsub.f32 %v2504_v0, %v1001_v6 }
 0x51d   :  { %2264 = vmatprep.subr.mxu0 %v1002_v59 }
 0x51e   :  { %2265 = vmatpush3.msra.mxu0 %v1002_v59 }
 0x51f   :  { %2267 = vmatmul.mubr.msk.f32.vlgmr.msra.gmra.mrb[16].mxu0 %vm59_vm0, %v24_v7  ;;  %2408 = vmatprep.subr.bf16.mxu0 %v2407_v2  ;;  %v1457_v7 = vpop.trf.xlu0 }
 0x520   :  { %2410 = vmatpush3.bf16.msra.mxu0 %v2407_v2 }
 0x521   :  { %2412 = vmatprep.subr.bf16.mxu0 %v2411_v55 }
 0x524   :  { %2414 = vmatpush3.bf16.msra.mxu0 %v2411_v55  ;;  %v1320_v55 = vpop.trf.xlu1 }
 0x525   :  { %2421 = vmatprep.subr.msk.bf16.mxu0 %vm2843_vm2, %v2712_v50 }
 0x528   :  { %v1321_v25 = vpop.trf.xlu1 }
 0x5f2   :  { %v2268_v52 = vpop.f32.mrb[16].mxu0 }
 0x5f3   :  { %v1107_v1 = vadd.f32 %v2268_v52, %v1028_v39  ;;  %v1101_v2 = vpop.f32.mrb[17].mxu0 }
 0x5f4   :  { %v1102_v54 = vadd.f32 %v1101_v2, %v1028_v39 }
 0x5f5   :  { %v1111_v56 = vmax.f32 %v1107_v1, 0.0 }
 0x5f6   :  { %v1110_v45 = vmax.f32 %v1102_v54, 0.0 }
 0x5f8   :  { %2277 = vmatprep.mubr.msk.f32.mxu1 %vm165_vm1, %v1110_v45 }
 0x5f9   :  { %2278 = vmatmul.mubr.msk.f32.vlgmr.msra.gmra.mrb[14].mxu1 %vm165_vm1, %v1111_v56 }
 0x5fa   :  { %2418 = vmatpush3.bf16.msra.mxu1 %v2415_v24  ;;  %2295 = vmatprep.mubr.msk.f32.mxu1 %vm642_vm7, %v1318_v46  ;;  %v1594_v24 = vpop.trf.xlu1 }
 0x5fb   :  { %2425 = vmatprep.subr.bf16.mxu1 %v2477_v62  ;;  %v883_v62 = vrot.slane %v882_v26, 2 }
 0x5fd   :  { %2296 = vmatmul.mubr.msk.f32.vlgmr.msra.gmra.mrb[16].mxu1 %vm642_vm7, %v1319_v37  ;;  %v884_v22 = vadd.f32 %v883_v62, %v882_v26  ;;  %v28_v62 = vld [vmem:[%s2966_s0 + $0x68] sm:$0xff] }
 0x5fe   :  { %2428 = vmatpush3.bf16.msk.msra.mxu1 %vm2427_vm3, %v2426_v35  ;;  %2298 = vmatprep.mubr.msk.f32.mxu1 %vm642_vm7, %v1320_v55 }
 0x5ff   :  { %v885_v3 = vrot.slane %v884_v22, 1 }
 0x601   :  { %2299 = vmatmul.mubr.msk.f32.gmra.mrb[18].mxu1 %vm642_vm7, %v1321_v25  ;;  %v886_v6 = vadd.f32 %v885_v3, %v884_v22  ;;  %v2908_v25 = vld [vmem:[%s2968_s2 + $0x48] sm:$0x1]  ;;  %v27_v3 = vld [vmem:[%s2966_s0 + $0x60] sm:$0xff] }
 0x602   :  { %2315 = vmatprep.mubr.msk.f32.mxu1 %vm2478_vm10, %v2479_v63 }
 0x603   :  { %v1013_v27 = vmul.f32 %v886_v6, %v2724_v60  ;;  %v1458_v60 = vpop.trf.xlu0 }
 0x605   :  { %2316 = vmatmul.mubr.msk.f32.vlgmr.msra.gmra.mrb[20].mxu1 %vm642_vm7, %v1594_v24  ;;  %v1014_v35 = vsub.f32 %v2616_v34, %v1013_v27 }
 0x607   :  { %v1115_v58 = vrot.slane %v1014_v35, %v2574_v16  ;;  %v1459_v2 = vpop.trf.xlu0 }
 0x6cc   :  { %v2279_v59 = vpop.f32.mrb[14].mxu1 }
 0x6cd   :  { %v1194_v63 = vadd.f32 %v2279_v59, %v1115_v58  ;;  %v1188_v13 = vpop.f32.mrb[15].mxu1 }
 0x6ce   :  { %v1189_v14 = vadd.f32 %v1188_v13, %v1115_v58 }
 0x6cf   :  { %v1198_v20 = vmax.f32 %v1194_v63, 0.0 }
 0x6d0   :  { %v1197_v21 = vmax.f32 %v1189_v14, 0.0  ;;  %v2297_v23 = vpop.f32.mrb[16].mxu1 }
 0x6d1   :  { %v1707_v42 = vmul.f32 %v2297_v23, %v2797_v33  ;;  %v1412_v41 = vpop.f32.mrb[17].mxu1 }
 0x6d2   :  { %v1706_v44 = vmul.f32 %v1412_v41, %v2802_v38  ;;  %2288 = vmatprep.mubr.msk.f32.mxu0 %vm165_vm1, %v1197_v21 }
 0x6d3   :  { %v1711_v46 = vsub.f32 %v2570_v12, %v1707_v42  ;;  %2289 = vmatmul.mubr.msk.f32.vlgmr.msra.gmra.mrb[18].mxu0 %vm165_vm1, %v1198_v20  ;;  %v1695_v20 = vsub.f32 %v2579_v17, %v2792_v30 }
 0x6d4   :  { %v1710_v43 = vsub.f32 %v2565_v11, %v1706_v44  ;;  %2424 = vmatpush3.bf16.msk.msra.mxu0 %vm2843_vm2, %v2712_v50  ;;  %v2300_v37 = vpop.f32.mrb[18].mxu1  ;;  %2305 = vmatprep.mubr.msk.f32.mxu0 %vm642_vm7, %v1456_v29 }
 0x6d5   :  { %v1709_v33 = vmul.f32 %v2300_v37, %v2811_v47  ;;  %v1422_v39 = vpop.f32.mrb[19].mxu1  ;;  %v25_v47 = vld [vmem:[%s2966_s0 + $0x50] sm:$0xff] }
 0x6d6   :  { %v1708_v38 = vmul.f32 %v1422_v39, %v2816_v48  ;;  %v2437_v52 = vpack.c.bf16 %v1711_v46, %v1710_v43 }
 0x6d7   :  { %v1713_v1 = vsub.f32 %v2607_v32, %v1709_v33  ;;  %2306 = vmatmul.mubr.msk.f32.vlgmr.msra.gmra.mrb[20].mxu0 %vm642_vm7, %v1457_v7  ;;  %v743_v32 = vrot.slane %v2676_v15, 4 }
 0x6d8   :  { %v1712_v12 = vsub.f32 %v2602_v31, %v1708_v38  ;;  %v1679_v11 = vpop.f32.mrb[20].mxu1  ;;  %2308 = vmatprep.mubr.msk.f32.mxu0 %vm642_vm7, %v1458_v60  ;;  %v26_v31 = vld [vmem:[%s2966_s0 + $0x58] sm:$0xff] }
 0x6d9   :  { %v1692_v50 = vmul.f32 %v1679_v11, %v2831_v57  ;;  %v2317_v10 = vpop.f32.mrb[21].mxu1 }
 0x6da   :  { %v2441_v54 = vpack.c.bf16 %v1713_v1, %v1712_v12 }
 0x6db   :  { %v1693_v48 = vsub.f32 %v2504_v0, %v1692_v50  ;;  %2309 = vmatmul.mubr.msk.f32.gmra.mrb[22].mxu0 %vm642_vm7, %v1459_v2  ;;  %v744_v0 = vadd.f32 %v743_v32, %v2676_v15  ;;  %v1705_v50 = vsub.f32 %v2616_v34, %v2727_v61 }
 0x6dc   :  { %2320 = vmatprep.mubr.msk.f32.mxu0 %vm59_vm0, %v25_v47 }
 0x6dd   :  { %2318 = vmatprep.subr.mxu0 %v1693_v48  ;;  %v745_v57 = vrot.slane %v744_v0, 2  ;;  %v1806_v10 = vrot.slane %v1705_v50, %v2574_v16 }
 0x6de   :  { %2319 = vmatpush3.msra.mxu0 %v1693_v48 }
 0x6df   :  { %2321 = vmatmul.mubr.msk.f32.vlgmr.msra.gmra.mrb[24].mxu0 %vm59_vm0, %v26_v31  ;;  %2438 = vmatprep.subr.bf16.mxu0 %v2437_v52  ;;  %v746_v45 = vadd.f32 %v745_v57, %v744_v0  ;;  %v1432_v57 = vsel %vm59_vm0, %v2678_v18, 0.0  ;;  %v30_v18 = vld [vmem:[%s2966_s0 + $0x78] sm:$0xff] }
 0x6e0   :  { %2440 = vmatpush3.bf16.msra.mxu0 %v2437_v52 }
 0x6e1   :  { %2442 = vmatprep.subr.bf16.mxu0 %v2441_v54  ;;  %v747_v55 = vrot.slane %v746_v45, 1 }
 0x6e3   :  { %v748_v56 = vadd.f32 %v747_v55, %v746_v45  ;;  %v1431_v45 = vsel %vm59_vm0, %v2681_v19, 0.0  ;;  %v29_v19 = vld [vmem:[%s2966_s0 + $0x70] sm:$0xff] }
 0x6e4   :  { %2444 = vmatpush3.bf16.msra.mxu0 %v2441_v54  ;;  %v1433_v55 = vadd.f32 %v1432_v57, %v1431_v45 }
 0x6e5   :  { %v1023_v24 = vmul.f32 %v748_v56, %v2908_v25 }
 0x6e6   :  { %v1434_v34 = vrot.slane %v1433_v55, 4 }
 0x6e7   :  { %v1024_v28 = vsub.f32 %v2657_v49, %v1023_v24 }
 0x6e8   :  { %v1435_v61 = vadd.f32 %v1434_v34, %v1433_v55 }
 0x6e9   :  { %v1202_v26 = vrot.slane %v1024_v28, %v2574_v16 }
 0x6ea   :  { %v1436_v56 = vrot.slane %v1435_v61, 2 }
 0x6ec   :  { %v1437_v24 = vadd.f32 %v1436_v56, %v1435_v61 }
 0x6ee   :  { %v1438_v28 = vrot.slane %v1437_v24, 1 }
 0x7a6   :  { %v2290_v15 = vpop.f32.mrb[18].mxu0 }
 0x7a7   :  { %v1281_v22 = vadd.f32 %v2290_v15, %v1202_v26  ;;  %v1275_v6 = vpop.f32.mrb[19].mxu0 }
 0x7a8   :  { %v1276_v27 = vadd.f32 %v1275_v6, %v1202_v26  ;;  %v1439_v26 = vadd.f32 %v1438_v28, %v1437_v24 }
 0x7a9   :  { %v1285_v29 = vsub.f32 %v1281_v22, %v28_v62 }
 0x7aa   :  { %v1284_v35 = vsub.f32 %v1276_v27, %v27_v3  ;;  %v2307_v58 = vpop.f32.mrb[20].mxu0  ;;  %v1714_v62 = vmul.f32 %v1439_v26, %v2908_v25 }
 0x7ab   :  { %v1287_v59 = vmul.f32 %v1285_v29, %v1285_v29  ;;  %v1697_v7 = vmul.f32 %v2307_v58, %v2760_v36  ;;  %v1550_v63 = vpop.f32.mrb[21].mxu0 }
 0x7ac   :  { %v1286_v13 = vmul.f32 %v1284_v35, %v1284_v35  ;;  %v1696_v14 = vmul.f32 %v1550_v63, %v2767_v40  ;;  %v1715_v15 = vsub.f32 %v2657_v49, %v1714_v62 }
 0x7ad   :  { %v1701_v21 = vsub.f32 %v2528_v5, %v1697_v7  ;;  %v1289_v23 = vsel %vm59_vm0, %v1287_v59, 0.0  ;;  %v1719_v5 = vrot.slane %v1695_v20, %v2574_v16 }
 0x7ae   :  { %v1700_v42 = vsub.f32 %v2522_v4, %v1696_v14  ;;  %v2310_v41 = vpop.f32.mrb[22].mxu0  ;;  %v1288_v44 = vsel %vm59_vm0, %v1286_v13, 0.0  ;;  %v1893_v22 = vrot.slane %v1715_v15, %v2574_v16 }
 0x7af   :  { %v1699_v60 = vmul.f32 %v2310_v41, %v2774_v51  ;;  %v1560_v46 = vpop.f32.mrb[23].mxu0  ;;  %v1290_v36 = vadd.f32 %v1289_v23, %v1288_v44 }
 0x7b0   :  { %v1698_v43 = vmul.f32 %v1560_v46, %v2780_v53  ;;  %v2429_v37 = vpack.c.bf16 %v1701_v21, %v1700_v42 }
 0x7b1   :  { %v1703_v40 = vsub.f32 %v2554_v9, %v1699_v60  ;;  %1291 = vadd.xlane.f32.xlu1 %v1290_v36 }
 0x7b2   :  { %v1702_v33 = vsub.f32 %v2549_v8, %v1698_v43  ;;  %v2322_v17 = vpop.f32.mrb[24].mxu0  ;;  %2430 = vmatprep.subr.bf16.mxu1 %v2429_v37 }
 0x7b3   :  { %v1798_v4 = vadd.f32 %v2322_v17, %v1719_v5  ;;  %v1792_v30 = vpop.f32.mrb[25].mxu0  ;;  %2432 = vmatpush3.bf16.msra.mxu1 %v2429_v37 }
 0x7b4   :  { %v1793_v39 = vadd.f32 %v1792_v30, %v1719_v5  ;;  %v2433_v38 = vpack.c.bf16 %v1703_v40, %v1702_v33 }
 0x7b5   :  { %v1802_v52 = vmax.f32 %v1798_v4, 0.0 }
 0x7b6   :  { %v1801_v51 = vmax.f32 %v1793_v39, 0.0  ;;  %2434 = vmatprep.subr.bf16.mxu1 %v2433_v38 }
 0x7b7   :  { %2436 = vmatpush3.bf16.msra.mxu1 %v2433_v38 }
 0x7b8   :  { %2331 = vmatprep.mubr.msk.f32.mxu1 %vm165_vm1, %v1801_v51 }
 0x7ba   :  { %2332 = vmatmul.mubr.msk.f32.vlgmr.msra.gmra.mrb[22].mxu1 %vm165_vm1, %v1802_v52 }
 0x83e   :  { %v1292_v9 = vpop.xlane.xlu1 %1291 }
 0x83f   :  { %v1293_v53 = vrot.slane %v1292_v9, 4 }
 0x841   :  { %v1294_v1 = vadd.f32 %v1293_v53, %v1292_v9 }
 0x843   :  { %v1295_v12 = vrot.slane %v1294_v1, 2 }
 0x845   :  { %v1296_v8 = vadd.f32 %v1295_v12, %v1294_v1 }
 0x847   :  { %v1297_v11 = vrot.slane %v1296_v8, 1 }
 0x849   :  { %v1298_v2 = vadd.f32 %v1297_v11, %v1296_v8 }
 0x84b   :  { %2445 = vpush %v1298_v2 }
 0x87c   :  { %s2446_s0 = spop %2445 }
 0x87d   :  { %v1300_v41 = vstv %s2446_s0 }
 0x88d   :  { %v2333_v47 = vpop.f32.mrb[22].mxu1 }
 0x88e   :  { %v1885_v54 = vadd.f32 %v2333_v47, %v1806_v10  ;;  %v1879_v48 = vpop.f32.mrb[23].mxu1 }
 0x88f   :  { %v1880_v31 = vadd.f32 %v1879_v48, %v1806_v10 }
 0x890   :  { %v1889_v0 = vmax.f32 %v1885_v54, 0.0 }
 0x891   :  { %v1888_v32 = vmax.f32 %v1880_v31, 0.0 }
 0x893   :  { %2342 = vmatprep.mubr.msk.f32.mxu0 %vm165_vm1, %v1888_v32 }
 0x894   :  { %2343 = vmatmul.mubr.msk.f32.vlgmr.msra.gmra.mrb[26].mxu0 %vm165_vm1, %v1889_v0  ;;  %vm1994_vm1 = vcmask 0  }
 0x967   :  { %v2344_v3 = vpop.f32.mrb[26].mxu0 }
 0x968   :  { %v1972_v6 = vadd.f32 %v2344_v3, %v1893_v22  ;;  %v1966_v27 = vpop.f32.mrb[27].mxu0 }
 0x969   :  { %v1967_v29 = vadd.f32 %v1966_v27, %v1893_v22 }
 0x96a   :  { %v1976_v35 = vsub.f32 %v1972_v6, %v30_v18 }
 0x96b   :  { %v1975_v58 = vsub.f32 %v1967_v29, %v29_v19 }
 0x96c   :  { %v1978_v59 = vmul.f32 %v1976_v35, %v1976_v35 }
 0x96d   :  { %v1977_v25 = vmul.f32 %v1975_v58, %v1975_v58 }
 0x96e   :  { %v1980_v49 = vsel %vm59_vm0, %v1978_v59, 0.0 }
 0x96f   :  { %v1979_v16 = vsel %vm59_vm0, %v1977_v25, 0.0 }
 0x970   :  { %v1981_v7 = vadd.f32 %v1980_v49, %v1979_v16 }
 0x972   :  { %1982 = vadd.xlane.f32.xlu0 %v1981_v7 }
 0x9ff   :  { %v1983_v63 = vpop.xlane.xlu0 %1982 }
 0xa00   :  { %v1984_v13 = vrot.slane %v1983_v63, 4 }
 0xa02   :  { %v1985_v14 = vadd.f32 %v1984_v13, %v1983_v63 }
 0xa04   :  { %v1986_v21 = vrot.slane %v1985_v14, 2 }
 0xa06   :  { %v1987_v23 = vadd.f32 %v1986_v21, %v1985_v14 }
 0xa08   :  { %v1988_v20 = vrot.slane %v1987_v23, 1 }
 0xa0a   :  { %v1989_v42 = vadd.f32 %v1988_v20, %v1987_v23 }
 0xa0c   :  { %2447 = vpush %v1989_v42 }
 0xa3d   :  { %s2448_s9 = spop %2447 }
 0xa3e   :  { %v1991_v44 = vstv %s2448_s9 }
 0xa3f   :  { %v1992_v60 = vadd.f32 %v1991_v44, %v1300_v41 }
 0xa41   :  { %v1993_v46 = vmul.f32 0.00390625, %v1992_v60 }
 0xa43   :  { %1995 = vst.msk [vmem:[#allocation2] sm:$0x1] %vm1994_vm1, %v1993_v46 }
 0xa44   :  { %2464 = shalt.err (!%p2461_p4)
}
 0xa45   :  { %s2465_s16 = scalar_lea.hbm %s2969_s3, 16 }
 0xa46   :  { %p2466_p5 = scmp.ne.s32.totalorder %s2969_s3, %s2465_s16  ;;  %p2469_p6 = scmp.lt.u32.totalorder %s2465_s16, %s2969_s3 }
 0xa48   :  { %p2471_p7 = pnand %p2469_p6, %p2466_p5 }
 0xa4a   :  { %2474 = shalt.err (!%p2471_p7)
}
 0xa4b   :  { %2005 = dma.vmem_to_hbm [thread:$0]  %s2003_s11, 16, %s2969_s3, [#allocation3]  }
 0xa4c   :  { %2475 = dma.done.wait [#allocation3], 16  }
 0xa4d   :  { %2476 = vsyncadd [#allocation3], 4294967280 }
 0xa4e   :  { %2009 = vsyncpa [#allocation3], 1 }

</bundles_post_ra>
